<compile_context>
chip_gen: v5e
topology: v5e:2x2
jax: 0.10.0
libtpu: 0.0.40
codegen_flags: <defaults>
</compile_context>

<pallas_src>
import functools

import jax
import jax.numpy as jnp
import numpy as np
from jax.experimental import pallas as pl
from jax.experimental.pallas import tpu as pltpu

BN_EPS = 1e-5
LANE = 128


def _round_up(x, m):
    return ((x + m - 1) // m) * m


# ----------------------------- Pallas kernel ------------------------------ #
def _gemm_bn_kernel(*refs, apply_relu, has_residual):
    """Fused GEMM + BN(affine) [+ residual] [+ ReLU] over one row-tile."""
    if has_residual:
        x_ref, w_ref, s_ref, b_ref, r_ref, o_ref = refs
    else:
        x_ref, w_ref, s_ref, b_ref, o_ref = refs
        r_ref = None
    # bf16 x bf16 -> f32 on the MXU.
    acc = jnp.dot(x_ref[...], w_ref[...], preferred_element_type=jnp.float32)
    # Epilogue in f32 (v5e VPU has no bf16 path).
    y = acc * s_ref[...] + b_ref[...]
    if r_ref is not None:
        y = y + r_ref[...].astype(jnp.float32)
    if apply_relu:
        y = jnp.maximum(y, 0.0)
    o_ref[...] = y.astype(o_ref.dtype)


def conv_bn_gemm(cols, w_mat, scale, bias, residual=None, apply_relu=True,
                 out_dtype=jnp.float32, tm=256):
    """Fused conv-as-GEMM Pallas call, tiled over the M (pixel) axis.

    cols:  (M, K)       bf16 im2col patches
    w_mat: (K, Coutp)   bf16 weights, Coutp lane-padded to a multiple of 128
    scale/bias: (Coutp,) f32 folded BN
    residual: optional (M, Coutp) residual added before the final ReLU
    """
    M, K = cols.shape
    Coutp = w_mat.shape[1]

    # Clamp the row tile so tiny layers use a single lane-aligned tile; ragged
    # tails are handled by the grid (overhanging block rows are dropped on
    # writeback), so no HBM row padding is needed.
    tm = min(tm, _round_up(M, 8))
    grid = (pl.cdiv(M, tm),)

    args = [cols, w_mat,
            scale.reshape(1, Coutp).astype(jnp.float32),
            bias.reshape(1, Coutp).astype(jnp.float32)]
    in_specs = [
        pl.BlockSpec((tm, K), lambda i: (i, 0)),       # im2col row tile
        pl.BlockSpec((K, Coutp), lambda i: (0, 0)),    # full weight (grid-invariant)
        pl.BlockSpec((1, Coutp), lambda i: (0, 0)),    # BN scale
        pl.BlockSpec((1, Coutp), lambda i: (0, 0)),    # BN bias
    ]
    if residual is not None:
        args.append(residual)
        in_specs.append(pl.BlockSpec((tm, Coutp), lambda i: (i, 0)))

    kernel = functools.partial(_gemm_bn_kernel,
                               apply_relu=apply_relu,
                               has_residual=residual is not None)

    # Explicit VMEM budget: ~2 pipeline buffers per streamed operand.
    def nbytes(shape, dt):
        return int(np.prod(shape)) * jnp.dtype(dt).itemsize
    vmem_need = (2 * nbytes((tm, K), cols.dtype)
                 + 2 * nbytes((K, Coutp), w_mat.dtype)
                 + 4 * nbytes((1, Coutp), jnp.float32)
                 + 2 * nbytes((tm, Coutp), jnp.float32)   # residual / acc
                 + 2 * nbytes((tm, Coutp), out_dtype))
    vmem_limit = int(min(64 * 1024 * 1024, max(32 * 1024 * 1024, 2 * vmem_need)))

    flops = 2 * M * K * Coutp
    bytes_accessed = (nbytes((M, K), cols.dtype)
                      + nbytes((K, Coutp), w_mat.dtype)
                      + nbytes((M, Coutp), out_dtype)
                      + (nbytes((M, Coutp), residual.dtype)
                         if residual is not None else 0))

    out = pl.pallas_call(
        kernel,
        out_shape=jax.ShapeDtypeStruct((M, Coutp), out_dtype),
        grid=grid,
        in_specs=in_specs,
        out_specs=pl.BlockSpec((tm, Coutp), lambda i: (i, 0)),
        compiler_params=pltpu.CompilerParams(
            dimension_semantics=("parallel",),
            vmem_limit_bytes=vmem_limit),
        cost_estimate=pl.CostEstimate(flops=flops, transcendentals=0,
                                      bytes_accessed=bytes_accessed),
    )(*args)
    return out   # (M, Coutp) — caller slices off the lane padding when needed


# ------------------------------- JAX glue ---------------------------------- #
def im2col(x_nhwc, ksize, stride, pad):
    """Extract conv patches -> (N*Ho*Wo, ksize*ksize*C), row-major over (N,Ho,Wo)."""
    N, H, W, C = x_nhwc.shape
    Ho = (H + 2 * pad - ksize) // stride + 1
    Wo = (W + 2 * pad - ksize) // stride + 1
    xp = jnp.pad(x_nhwc, ((0, 0), (pad, pad), (pad, pad), (0, 0)))
    patches = []
    for kh in range(ksize):
        for kw in range(ksize):
            patches.append(
                xp[:, kh:kh + stride * (Ho - 1) + 1:stride,
                      kw:kw + stride * (Wo - 1) + 1:stride, :])
    cols = jnp.concatenate(patches, axis=-1)          # (N, Ho, Wo, k*k*C)
    return cols.reshape(N * Ho * Wo, ksize * ksize * C), Ho, Wo


def fold_bn(bn):
    scale = bn["gamma"] * jax.lax.rsqrt(bn["var"] + BN_EPS)
    bias = bn["beta"] - bn["mean"] * scale
    return scale, bias


def prepare_params(params, compute_dtype=jnp.bfloat16):
    """One-time weight prep: fold BN, reshape conv weights to GEMM layout,
    cast to bf16 and zero-pad Cout to a lane-dense multiple of 128."""
    Cout = params["w1"].shape[0]
    Coutp = _round_up(Cout, LANE)

    def conv_w(w):  # OIHW -> (kh*kw*Cin, Coutp), matching im2col (kh,kw,C) order
        co, ci, kh, kw = w.shape
        m = jnp.transpose(w, (2, 3, 1, 0)).reshape(kh * kw * ci, co)
        return jnp.pad(m, ((0, 0), (0, Coutp - co))).astype(compute_dtype)

    def bn_sb(bn):
        s, b = fold_bn(bn)
        return (jnp.pad(s, (0, Coutp - Cout)).astype(jnp.float32),
                jnp.pad(b, (0, Coutp - Cout)).astype(jnp.float32))

    prepped = dict(w1=conv_w(params["w1"]), bn1=bn_sb(params["bn1"]),
                   w2=conv_w(params["w2"]), bn2=bn_sb(params["bn2"]))
    if "ws" in params:
        prepped["ws"] = conv_w(params["ws"])
        prepped["bns"] = bn_sb(params["bns"])
    return prepped


@functools.partial(jax.jit, static_argnames=("stride", "cout"))
def residual_block_pallas(x_nchw, prepped, stride, cout):
    """Forward pass of the ResidualBlock. Input/output are NCHW (PyTorch)."""
    x = jnp.transpose(x_nchw, (0, 2, 3, 1)).astype(jnp.float32)   # -> NHWC
    N, H, W, Cin = x.shape
    Coutp = prepped["w1"].shape[1]

    # conv1 (3x3, stride) + bn1 + relu. bf16 output feeds conv2's bf16 GEMM.
    cols1, Ho, Wo = im2col(x.astype(jnp.bfloat16), 3, stride, 1)
    s1, b1 = prepped["bn1"]
    out1 = conv_bn_gemm(cols1, prepped["w1"], s1, b1, apply_relu=True,
                        out_dtype=jnp.bfloat16)                   # (M, Coutp)

    # shortcut: 1x1 conv (stride) + bn (already lane-padded), or identity.
    if "ws" in prepped:
        xs = x[:, ::stride, ::stride, :][:, :Ho, :Wo, :].astype(jnp.bfloat16)
        colss = xs.reshape(N * Ho * Wo, Cin)
        ss, bs = prepped["bns"]
        identity = conv_bn_gemm(colss, prepped["ws"], ss, bs,
                                apply_relu=False, out_dtype=jnp.float32)
    else:
        assert stride == 1 and Cin == cout, \
            "identity shortcut requires stride == 1 and in_channels == out_channels"
        identity = jnp.pad(x.reshape(N * H * W, Cin),
                           ((0, 0), (0, Coutp - cout)))           # f32 residual

    # conv2 (3x3, stride 1) + bn2 + residual add + relu (all fused in kernel).
    out1_img = out1[:, :cout].reshape(N, Ho, Wo, cout)            # drop lane pad
    cols2, _, _ = im2col(out1_img, 3, 1, 1)                       # already bf16
    s2, b2 = prepped["bn2"]
    out = conv_bn_gemm(cols2, prepped["w2"], s2, b2, residual=identity,
                       apply_relu=True, out_dtype=jnp.float32)

    out = out[:, :cout].reshape(N, Ho, Wo, cout)
    return jnp.transpose(out, (0, 3, 1, 2))                       # -> NCHW


# -------------------------- params + reference ----------------------------- #
def init_params(key, in_ch, out_ch, with_shortcut):
    ks = jax.random.split(key, 12)

    def conv_w(k, cout, cin, kh, kw):
        fan_in = cin * kh * kw
        return (jax.random.normal(k, (cout, cin, kh, kw), jnp.float32)
                * (2.0 / fan_in) ** 0.5)

    def bn(kk, c):
        k1, k2, k3, k4 = jax.random.split(kk, 4)
        return dict(
            gamma=jax.random.uniform(k1, (c,), jnp.float32, 0.5, 1.5),
            beta=jax.random.normal(k2, (c,), jnp.float32) * 0.1,
            mean=jax.random.normal(k3, (c,), jnp.float32) * 0.1,
            var=jax.random.uniform(k4, (c,), jnp.float32, 0.5, 1.5),
        )

    params = dict(
        w1=conv_w(ks[0], out_ch, in_ch, 3, 3),
        bn1=bn(ks[1], out_ch),
        w2=conv_w(ks[2], out_ch, out_ch, 3, 3),
        bn2=bn(ks[3], out_ch),
    )
    if with_shortcut:
        params["ws"] = conv_w(ks[4], out_ch, in_ch, 1, 1)
        params["bns"] = bn(ks[5], out_ch)
    return params


def reference_residual_block(x, params, stride):
    """Pure-JAX f32 reference (lax.conv) mirroring the PyTorch forward (eval BN)."""
    def conv(x, w, s, pad):
        return jax.lax.conv_general_dilated(
            x, w, (s, s), [(pad, pad), (pad, pad)],
            dimension_numbers=("NCHW", "OIHW", "NCHW"))

    def bn(x, b):
        sc, bi = fold_bn(b)
        return x * sc[None, :, None, None] + bi[None, :, None, None]

    identity = x
    if "ws" in params:
        identity = bn(conv(x, params["ws"], stride, 0), params["bns"])
    out = jnp.maximum(bn(conv(x, params["w1"], stride, 1), params["bn1"]), 0.0)
    out = bn(conv(out, params["w2"], 1, 1), params["bn2"])
    return jnp.maximum(out + identity, 0.0)


# --------------------------------- main ------------------------------------ #
if __name__ == "__main__":
    key = jax.random.PRNGKey(0)
    kx, kp1, kp2 = jax.random.split(key, 3)
    x = jax.random.normal(kx, (2, 4, 16, 16), jnp.float32)  # NCHW

    # Tolerances reflect the deliberate bf16 matmul-input / bf16 inter-layer
    # activation path (f32 accumulation + f32 epilogue); outputs are O(1).
    RTOL, ATOL = 2e-2, 2e-2

    # Downsampling block: stride=2, channels 4 -> 8 (conv+bn shortcut path).
    p_down = init_params(kp1, 4, 8, with_shortcut=True)
    prep_down = prepare_params(p_down)
    y_down = jax.block_until_ready(
        residual_block_pallas(x, prep_down, stride=2, cout=8))
    assert y_down.shape == (2, 8, 8, 8)
    ref_down = reference_residual_block(x, p_down, 2)
    np.testing.assert_allclose(np.asarray(y_down), np.asarray(ref_down),
                               rtol=RTOL, atol=ATOL)

    # Identity block: stride=1, channels preserved (empty shortcut).
    p_id = init_params(kp2, 4, 4, with_shortcut=False)
    prep_id = prepare_params(p_id)
    y_id = jax.block_until_ready(
        residual_block_pallas(x, prep_id, stride=1, cout=4))
    assert y_id.shape == (2, 4, 16, 16)
    ref_id = reference_residual_block(x, p_id, 1)
    np.testing.assert_allclose(np.asarray(y_id), np.asarray(ref_id),
                               rtol=RTOL, atol=ATOL)

    print("KERNEL_OK")
</pallas_src>

<mosaic_0001>
module attributes {stable_mosaic.version = 11 : i64} {
  func.func @_gemm_bn_kernel(%arg0: i32, %arg1: memref<128x36xbf16, #tpu.memory_space<vmem>>, %arg2: memref<36x128xbf16, #tpu.memory_space<vmem>>, %arg3: memref<1x128xf32, #tpu.memory_space<vmem>>, %arg4: memref<1x128xf32, #tpu.memory_space<vmem>>, %arg5: memref<128x128xbf16, #tpu.memory_space<vmem>>) attributes {dimension_semantics = [#tpu.dimension_semantics<parallel>], iteration_bounds = array<i64: 1>, scalar_prefetch = 0 : i64, scratch_operands = 0 : i64, tpu.core_type = #tpu.core_type<tc>, window_params = [{transform_indices = @transform_0, window_bounds = array<i64: 128, 36>}, {pipeline_mode = #tpu.pipeline_mode<synchronous>, transform_indices = @transform_1, window_bounds = array<i64: 36, 128>}, {pipeline_mode = #tpu.pipeline_mode<synchronous>, transform_indices = @transform_2, window_bounds = array<i64: 1, 128>}, {pipeline_mode = #tpu.pipeline_mode<synchronous>, transform_indices = @transform_3, window_bounds = array<i64: 1, 128>}, {transform_indices = @transform_4, window_bounds = array<i64: 128, 128>}]} {
    %c0 = arith.constant 0 : index
    %c0_0 = arith.constant 0 : index
    %0 = vector.load %arg1[%c0, %c0_0] : memref<128x36xbf16, #tpu.memory_space<vmem>>, vector<128x36xbf16>
    %c0_1 = arith.constant 0 : index
    %c0_2 = arith.constant 0 : index
    %1 = vector.load %arg2[%c0_1, %c0_2] : memref<36x128xbf16, #tpu.memory_space<vmem>>, vector<36x128xbf16>
    %cst = arith.constant dense<0.000000e+00> : vector<128x128xf32>
    %2 = tpu.matmul %0, %1, %cst {dimension_numbers = #tpu.dot_dimension_numbers<[1], [0], [0], [1], [0, 0, 1, 1], [], []>} : vector<128x36xbf16>, vector<36x128xbf16>, vector<128x128xf32> -> vector<128x128xf32>
    %c0_3 = arith.constant 0 : index
    %c0_4 = arith.constant 0 : index
    %3 = vector.load %arg3[%c0_3, %c0_4] : memref<1x128xf32, #tpu.memory_space<vmem>>, vector<1x128xf32>
    %4 = vector.broadcast %3 : vector<1x128xf32> to vector<128x128xf32>
    %5 = arith.mulf %2, %4 : vector<128x128xf32>
    %c0_5 = arith.constant 0 : index
    %c0_6 = arith.constant 0 : index
    %6 = vector.load %arg4[%c0_5, %c0_6] : memref<1x128xf32, #tpu.memory_space<vmem>>, vector<1x128xf32>
    %7 = vector.broadcast %6 : vector<1x128xf32> to vector<128x128xf32>
    %8 = arith.addf %5, %7 : vector<128x128xf32>
    %cst_7 = arith.constant 0.000000e+00 : f32
    %9 = vector.broadcast %cst_7 : f32 to vector<128x128xf32>
    %10 = arith.maximumf %8, %9 : vector<128x128xf32>
    %11 = arith.truncf %10 : vector<128x128xf32> to vector<128x128xbf16>
    %c0_8 = arith.constant 0 : index
    %c0_9 = arith.constant 0 : index
    %12 = vector.load %arg5[%c0_8, %c0_9] : memref<128x128xbf16, #tpu.memory_space<vmem>>, vector<128x128xbf16>
    tpu.vector_store %arg5[%c0_8, %c0_9], %11 {strides = array<i32>} : memref<128x128xbf16, #tpu.memory_space<vmem>>, vector<128x128xbf16>,
    return
  }
  func.func @transform_0(%arg0: i32) -> (i32, i32) {
    %c0_i32 = arith.constant 0 : i32
    %c0_i32_0 = arith.constant 0 : i32
    return %arg0, %c0_i32 : i32, i32
  }
  func.func @transform_1(%arg0: i32) -> (i32, i32) {
    %c0_i32 = arith.constant 0 : i32
    %c0_i32_0 = arith.constant 0 : i32
    %c0_i32_1 = arith.constant 0 : i32
    return %c0_i32, %c0_i32_0 : i32, i32
  }
  func.func @transform_2(%arg0: i32) -> (i32, i32) {
    %c0_i32 = arith.constant 0 : i32
    %c0_i32_0 = arith.constant 0 : i32
    %c0_i32_1 = arith.constant 0 : i32
    return %c0_i32, %c0_i32_0 : i32, i32
  }
  func.func @transform_3(%arg0: i32) -> (i32, i32) {
    %c0_i32 = arith.constant 0 : i32
    %c0_i32_0 = arith.constant 0 : i32
    %c0_i32_1 = arith.constant 0 : i32
    return %c0_i32, %c0_i32_0 : i32, i32
  }
  func.func @transform_4(%arg0: i32) -> (i32, i32) {
    %c0_i32 = arith.constant 0 : i32
    %c0_i32_0 = arith.constant 0 : i32
    return %arg0, %c0_i32 : i32, i32
  }
}

module attributes {stable_mosaic.version = 11 : i64} {
  func.func @_gemm_bn_kernel(%arg0: i32, %arg1: memref<128x4xbf16, #tpu.memory_space<vmem>>, %arg2: memref<4x128xbf16, #tpu.memory_space<vmem>>, %arg3: memref<1x128xf32, #tpu.memory_space<vmem>>, %arg4: memref<1x128xf32, #tpu.memory_space<vmem>>, %arg5: memref<128x128xf32, #tpu.memory_space<vmem>>) attributes {dimension_semantics = [#tpu.dimension_semantics<parallel>], iteration_bounds = array<i64: 1>, scalar_prefetch = 0 : i64, scratch_operands = 0 : i64, tpu.core_type = #tpu.core_type<tc>, window_params = [{transform_indices = @transform_0, window_bounds = array<i64: 128, 4>}, {pipeline_mode = #tpu.pipeline_mode<synchronous>, transform_indices = @transform_1, window_bounds = array<i64: 4, 128>}, {pipeline_mode = #tpu.pipeline_mode<synchronous>, transform_indices = @transform_2, window_bounds = array<i64: 1, 128>}, {pipeline_mode = #tpu.pipeline_mode<synchronous>, transform_indices = @transform_3, window_bounds = array<i64: 1, 128>}, {transform_indices = @transform_4, window_bounds = array<i64: 128, 128>}]} {
    %c0 = arith.constant 0 : index
    %c0_0 = arith.constant 0 : index
    %0 = vector.load %arg1[%c0, %c0_0] : memref<128x4xbf16, #tpu.memory_space<vmem>>, vector<128x4xbf16>
    %c0_1 = arith.constant 0 : index
    %c0_2 = arith.constant 0 : index
    %1 = vector.load %arg2[%c0_1, %c0_2] : memref<4x128xbf16, #tpu.memory_space<vmem>>, vector<4x128xbf16>
    %cst = arith.constant dense<0.000000e+00> : vector<128x128xf32>
    %2 = tpu.matmul %0, %1, %cst {dimension_numbers = #tpu.dot_dimension_numbers<[1], [0], [0], [1], [0, 0, 1, 1], [], []>} : vector<128x4xbf16>, vector<4x128xbf16>, vector<128x128xf32> -> vector<128x128xf32>
    %c0_3 = arith.constant 0 : index
    %c0_4 = arith.constant 0 : index
    %3 = vector.load %arg3[%c0_3, %c0_4] : memref<1x128xf32, #tpu.memory_space<vmem>>, vector<1x128xf32>
    %4 = vector.broadcast %3 : vector<1x128xf32> to vector<128x128xf32>
    %5 = arith.mulf %2, %4 : vector<128x128xf32>
    %c0_5 = arith.constant 0 : index
    %c0_6 = arith.constant 0 : index
    %6 = vector.load %arg4[%c0_5, %c0_6] : memref<1x128xf32, #tpu.memory_space<vmem>>, vector<1x128xf32>
    %7 = vector.broadcast %6 : vector<1x128xf32> to vector<128x128xf32>
    %8 = arith.addf %5, %7 : vector<128x128xf32>
    %c0_7 = arith.constant 0 : index
    %c0_8 = arith.constant 0 : index
    %9 = vector.load %arg5[%c0_7, %c0_8] : memref<128x128xf32, #tpu.memory_space<vmem>>, vector<128x128xf32>
    tpu.vector_store %arg5[%c0_7, %c0_8], %8 {strides = array<i32>} : memref<128x128xf32, #tpu.memory_space<vmem>>, vector<128x128xf32>,
    return
  }
  func.func @transform_0(%arg0: i32) -> (i32, i32) {
    %c0_i32 = arith.constant 0 : i32
    %c0_i32_0 = arith.constant 0 : i32
    return %arg0, %c0_i32 : i32, i32
  }
  func.func @transform_1(%arg0: i32) -> (i32, i32) {
    %c0_i32 = arith.constant 0 : i32
    %c0_i32_0 = arith.constant 0 : i32
    %c0_i32_1 = arith.constant 0 : i32
    return %c0_i32, %c0_i32_0 : i32, i32
  }
  func.func @transform_2(%arg0: i32) -> (i32, i32) {
    %c0_i32 = arith.constant 0 : i32
    %c0_i32_0 = arith.constant 0 : i32
    %c0_i32_1 = arith.constant 0 : i32
    return %c0_i32, %c0_i32_0 : i32, i32
  }
  func.func @transform_3(%arg0: i32) -> (i32, i32) {
    %c0_i32 = arith.constant 0 : i32
    %c0_i32_0 = arith.constant 0 : i32
    %c0_i32_1 = arith.constant 0 : i32
    return %c0_i32, %c0_i32_0 : i32, i32
  }
  func.func @transform_4(%arg0: i32) -> (i32, i32) {
    %c0_i32 = arith.constant 0 : i32
    %c0_i32_0 = arith.constant 0 : i32
    return %arg0, %c0_i32 : i32, i32
  }
}

module attributes {stable_mosaic.version = 11 : i64} {
  func.func @_gemm_bn_kernel(%arg0: i32, %arg1: memref<128x72xbf16, #tpu.memory_space<vmem>>, %arg2: memref<72x128xbf16, #tpu.memory_space<vmem>>, %arg3: memref<1x128xf32, #tpu.memory_space<vmem>>, %arg4: memref<1x128xf32, #tpu.memory_space<vmem>>, %arg5: memref<128x128xf32, #tpu.memory_space<vmem>>, %arg6: memref<128x128xf32, #tpu.memory_space<vmem>>) attributes {dimension_semantics = [#tpu.dimension_semantics<parallel>], iteration_bounds = array<i64: 1>, scalar_prefetch = 0 : i64, scratch_operands = 0 : i64, tpu.core_type = #tpu.core_type<tc>, window_params = [{transform_indices = @transform_0, window_bounds = array<i64: 128, 72>}, {pipeline_mode = #tpu.pipeline_mode<synchronous>, transform_indices = @transform_1, window_bounds = array<i64: 72, 128>}, {pipeline_mode = #tpu.pipeline_mode<synchronous>, transform_indices = @transform_2, window_bounds = array<i64: 1, 128>}, {pipeline_mode = #tpu.pipeline_mode<synchronous>, transform_indices = @transform_3, window_bounds = array<i64: 1, 128>}, {transform_indices = @transform_4, window_bounds = array<i64: 128, 128>}, {transform_indices = @transform_5, window_bounds = array<i64: 128, 128>}]} {
    %c0 = arith.constant 0 : index
    %c0_0 = arith.constant 0 : index
    %0 = vector.load %arg1[%c0, %c0_0] : memref<128x72xbf16, #tpu.memory_space<vmem>>, vector<128x72xbf16>
    %c0_1 = arith.constant 0 : index
    %c0_2 = arith.constant 0 : index
    %1 = vector.load %arg2[%c0_1, %c0_2] : memref<72x128xbf16, #tpu.memory_space<vmem>>, vector<72x128xbf16>
    %cst = arith.constant dense<0.000000e+00> : vector<128x128xf32>
    %2 = tpu.matmul %0, %1, %cst {dimension_numbers = #tpu.dot_dimension_numbers<[1], [0], [0], [1], [0, 0, 1, 1], [], []>} : vector<128x72xbf16>, vector<72x128xbf16>, vector<128x128xf32> -> vector<128x128xf32>
    %c0_3 = arith.constant 0 : index
    %c0_4 = arith.constant 0 : index
    %3 = vector.load %arg3[%c0_3, %c0_4] : memref<1x128xf32, #tpu.memory_space<vmem>>, vector<1x128xf32>
    %4 = vector.broadcast %3 : vector<1x128xf32> to vector<128x128xf32>
    %5 = arith.mulf %2, %4 : vector<128x128xf32>
    %c0_5 = arith.constant 0 : index
    %c0_6 = arith.constant 0 : index
    %6 = vector.load %arg4[%c0_5, %c0_6] : memref<1x128xf32, #tpu.memory_space<vmem>>, vector<1x128xf32>
    %7 = vector.broadcast %6 : vector<1x128xf32> to vector<128x128xf32>
    %8 = arith.addf %5, %7 : vector<128x128xf32>
    %c0_7 = arith.constant 0 : index
    %c0_8 = arith.constant 0 : index
    %9 = vector.load %arg5[%c0_7, %c0_8] : memref<128x128xf32, #tpu.memory_space<vmem>>, vector<128x128xf32>
    %10 = arith.addf %8, %9 : vector<128x128xf32>
    %cst_9 = arith.constant 0.000000e+00 : f32
    %11 = vector.broadcast %cst_9 : f32 to vector<128x128xf32>
    %12 = arith.maximumf %10, %11 : vector<128x128xf32>
    %c0_10 = arith.constant 0 : index
    %c0_11 = arith.constant 0 : index
    %13 = vector.load %arg6[%c0_10, %c0_11] : memref<128x128xf32, #tpu.memory_space<vmem>>, vector<128x128xf32>
    tpu.vector_store %arg6[%c0_10, %c0_11], %12 {strides = array<i32>} : memref<128x128xf32, #tpu.memory_space<vmem>>, vector<128x128xf32>,
    return
  }
  func.func @transform_0(%arg0: i32) -> (i32, i32) {
    %c0_i32 = arith.constant 0 : i32
    %c0_i32_0 = arith.constant 0 : i32
    return %arg0, %c0_i32 : i32, i32
  }
  func.func @transform_1(%arg0: i32) -> (i32, i32) {
    %c0_i32 = arith.constant 0 : i32
    %c0_i32_0 = arith.constant 0 : i32
    %c0_i32_1 = arith.constant 0 : i32
    return %c0_i32, %c0_i32_0 : i32, i32
  }
  func.func @transform_2(%arg0: i32) -> (i32, i32) {
    %c0_i32 = arith.constant 0 : i32
    %c0_i32_0 = arith.constant 0 : i32
    %c0_i32_1 = arith.constant 0 : i32
    return %c0_i32, %c0_i32_0 : i32, i32
  }
  func.func @transform_3(%arg0: i32) -> (i32, i32) {
    %c0_i32 = arith.constant 0 : i32
    %c0_i32_0 = arith.constant 0 : i32
    %c0_i32_1 = arith.constant 0 : i32
    return %c0_i32, %c0_i32_0 : i32, i32
  }
  func.func @transform_4(%arg0: i32) -> (i32, i32) {
    %c0_i32 = arith.constant 0 : i32
    %c0_i32_0 = arith.constant 0 : i32
    return %arg0, %c0_i32 : i32, i32
  }
  func.func @transform_5(%arg0: i32) -> (i32, i32) {
    %c0_i32 = arith.constant 0 : i32
    %c0_i32_0 = arith.constant 0 : i32
    return %arg0, %c0_i32 : i32, i32
  }
}

</mosaic_0001>

<bundles_post_ra>
// kernel: residual_block_pallas.3
= control target key start
LH: loop header
LB: loop body
LE: loop exit
PB: predicated region body
PF: predicated region fallthrough
CT: control target
= control target key end

     0   :  { %vm119_vm0 = vcmask 1041408   ;;  %vm94_vm1 = vcmask 293888   ;;  %s512_s1 = inlined_call_operand.vmem [shape: bf16[36,128], index: 1, kind: input, shape index: {}]   ;;  %s513_s2 = inlined_call_operand.vmem [shape: f32[1,128], index: 2, kind: input, shape index: {}]   ;;  %s514_s3 = inlined_call_operand.vmem [shape: f32[1,128], index: 3, kind: input, shape index: {}]   ;;  %s515_s0 = inlined_call_operand.vmem [shape: bf16[128,36], index: 0, kind: input, shape index: {}]   ;;  %s516_s4 = inlined_call_operand.vmem [shape: bf16[128,128], index: 4, kind: output, shape index: {}]  }
   0x1   :  { %v38_v0 = vld [vmem:[%s512_s1 + $0x10] sm:$0x3]  ;;  %v321_v4 = vld [vmem:[%s512_s1 + $0x8] sm:$0xff]  ;;  %v320_v5 = vld [vmem:[%s512_s1] sm:$0xff] }
   0x2   :  { %v88_v1 = vunpack.c.l.b16 %v38_v0  ;;  %v312_v6 = vld [vmem:[%s515_s0] sm:$0xff]  ;;  %v314_v7 = vld [vmem:[%s515_s0 + $0x10] sm:$0xff]  ;;  %v313_v10 = vld [vmem:[%s515_s0 + $0x8] sm:$0xff] }
   0x3   :  { %v316_v8 = vld [vmem:[%s515_s0 + $0x20] sm:$0xff]  ;;  %v318_v9 = vld [vmem:[%s515_s0 + $0x30] sm:$0xff]  ;;  %v315_v11 = vld [vmem:[%s515_s0 + $0x18] sm:$0xff] }
   0x4   :  { %v91_v2 = vpack.c.b16 %v88_v1, %v88_v1  ;;  %v317_v12 = vld [vmem:[%s515_s0 + $0x28] sm:$0xff]  ;;  %v319_v13 = vld [vmem:[%s515_s0 + $0x38] sm:$0xff]  ;;  %v449_v16 = vld [vmem:[%s513_s2] ss:$0 sm:$0xff] }
   0x5   :  { %v455_v18 = vld [vmem:[%s514_s3] ss:$0 sm:$0xff] }
   0x6   :  { %v121_v3 = vsel %vm119_vm0, %v91_v2, 0 }
   0x7   :  { %128 = vmatpush.bf16.msra.mxu0 %v121_v3  ;;  %369 = vmatpush.bf16.msra.mxu1 %v121_v3 }
   0x8   :  { %370 = vmatpush.bf16.msra.mxu2 %v121_v3  ;;  %371 = vmatpush.bf16.msra.mxu3 %v121_v3 }
   0xb   :  { %129 = vmatpush.bf16.msra.mxu0 %v321_v4  ;;  %372 = vmatpush.bf16.msra.mxu1 %v321_v4 }
   0xc   :  { %373 = vmatpush.bf16.msra.mxu2 %v321_v4  ;;  %374 = vmatpush.bf16.msra.mxu3 %v321_v4 }
   0xf   :  { %130 = vmatpush.bf16.msra.mxu0 %v320_v5  ;;  %375 = vmatpush.bf16.msra.mxu1 %v320_v5 }
  0x10   :  { %376 = vmatpush.bf16.msra.mxu2 %v320_v5  ;;  %377 = vmatpush.bf16.msra.mxu3 %v320_v5 }
  0x12   :  { %304 = vmatmul.msk.bf16.vlgmr.msra.gmra.mxu0 %vm94_vm1, %v312_v6  ;;  %306 = vmatmul.msk.bf16.vlgmr.msra.gmra.mxu1 %vm94_vm1, %v314_v7 }
  0x13   :  { %308 = vmatmul.msk.bf16.vlgmr.msra.gmra.mxu2 %vm94_vm1, %v316_v8  ;;  %310 = vmatmul.msk.bf16.vlgmr.msra.gmra.mxu3 %vm94_vm1, %v318_v9 }
  0x22   :  { %305 = vmatmul.msk.bf16.gmra.mxu0 %vm94_vm1, %v313_v10  ;;  %307 = vmatmul.msk.bf16.gmra.mxu1 %vm94_vm1, %v315_v11 }
  0x23   :  { %309 = vmatmul.msk.bf16.gmra.mxu2 %vm94_vm1, %v317_v12  ;;  %311 = vmatmul.msk.bf16.gmra.mxu3 %vm94_vm1, %v319_v13 }
  0x8f   :  { %v132_v14 = vpop.f32.mrf.mxu0  ;;  %v142_v15 = vpop.f32.mrf.mxu1 }
  0x90   :  { %v176_v17 = vmul.f32 %v449_v16, %v132_v14  ;;  %v180_v19 = vmul.f32 %v449_v16, %v142_v15 }
  0x92   :  { %v196_v24 = vadd.f32 %v455_v18, %v176_v17  ;;  %v200_v25 = vadd.f32 %v455_v18, %v180_v19 }
  0x94   :  { %v212_v32 = vmax.f32 %v196_v24, 0.0  ;;  %v216_v33 = vmax.f32 %v200_v25, 0.0 }
  0x96   :  { %v152_v20 = vpop.f32.mrf.mxu2  ;;  %v162_v21 = vpop.f32.mrf.mxu3 }
  0x97   :  { %v134_v22 = vpop.f32.mrf.mxu0  ;;  %v144_v23 = vpop.f32.mrf.mxu1  ;;  %v184_v30 = vmul.f32 %v449_v16, %v152_v20  ;;  %v188_v31 = vmul.f32 %v449_v16, %v162_v21 }
  0x98   :  { %v177_v26 = vmul.f32 %v449_v16, %v134_v22  ;;  %v181_v27 = vmul.f32 %v449_v16, %v144_v23 }
  0x99   :  { %v204_v40 = vadd.f32 %v455_v18, %v184_v30  ;;  %v208_v41 = vadd.f32 %v455_v18, %v188_v31 }
  0x9a   :  { %v197_v28 = vadd.f32 %v455_v18, %v177_v26  ;;  %v201_v29 = vadd.f32 %v455_v18, %v181_v27 }
  0x9b   :  { %v220_v48 = vmax.f32 %v204_v40, 0.0  ;;  %v224_v49 = vmax.f32 %v208_v41, 0.0 }
  0x9c   :  { %v213_v34 = vmax.f32 %v197_v28, 0.0  ;;  %v217_v35 = vmax.f32 %v201_v29, 0.0 }
  0x9e   :  { %v325_v36 = vpack.c.bf16 %v213_v34, %v212_v32  ;;  %v335_v37 = vpack.c.bf16 %v217_v35, %v216_v33  ;;  %v154_v38 = vpop.f32.mrf.mxu2  ;;  %v164_v39 = vpop.f32.mrf.mxu3 }
  0x9f   :  { %v185_v42 = vmul.f32 %v449_v16, %v154_v38  ;;  %v189_v43 = vmul.f32 %v449_v16, %v164_v39  ;;  %v137_v44 = vpop.f32.mrf.mxu0  ;;  %v147_v45 = vpop.f32.mrf.mxu1 }
  0xa0   :  { %326 = vst [vmem:[%s516_s4] sm:$0xff] %v325_v36   ;;  %v178_v52 = vmul.f32 %v449_v16, %v137_v44  ;;  %v182_v53 = vmul.f32 %v449_v16, %v147_v45 }
  0xa1   :  { %363 = vst [vmem:[%s516_s4 + $0x10] sm:$0xff] %v335_v37   ;;  %v205_v46 = vadd.f32 %v455_v18, %v185_v42  ;;  %v209_v47 = vadd.f32 %v455_v18, %v189_v43 }
  0xa2   :  { %v198_v60 = vadd.f32 %v455_v18, %v178_v52  ;;  %v202_v61 = vadd.f32 %v455_v18, %v182_v53 }
  0xa3   :  { %v221_v50 = vmax.f32 %v205_v46, 0.0  ;;  %v225_v51 = vmax.f32 %v209_v47, 0.0 }
  0xa4   :  { %v214_v4 = vmax.f32 %v198_v60, 0.0  ;;  %v218_v5 = vmax.f32 %v202_v61, 0.0 }
  0xa5   :  { %v345_v54 = vpack.c.bf16 %v221_v50, %v220_v48  ;;  %v355_v55 = vpack.c.bf16 %v225_v51, %v224_v49 }
  0xa6   :  { %v157_v56 = vpop.f32.mrf.mxu2  ;;  %v167_v57 = vpop.f32.mrf.mxu3 }
  0xa7   :  { %365 = vst [vmem:[%s516_s4 + $0x20] sm:$0xff] %v345_v54   ;;  %v139_v58 = vpop.f32.mrf.mxu0  ;;  %v149_v59 = vpop.f32.mrf.mxu1  ;;  %v186_v2 = vmul.f32 %v449_v16, %v157_v56  ;;  %v190_v3 = vmul.f32 %v449_v16, %v167_v57 }
  0xa8   :  { %367 = vst [vmem:[%s516_s4 + $0x30] sm:$0xff] %v355_v55   ;;  %v179_v62 = vmul.f32 %v449_v16, %v139_v58  ;;  %v183_v63 = vmul.f32 %v449_v16, %v149_v59 }
  0xa9   :  { %v206_v12 = vadd.f32 %v455_v18, %v186_v2  ;;  %v210_v13 = vadd.f32 %v455_v18, %v190_v3 }
  0xaa   :  { %v199_v0 = vadd.f32 %v455_v18, %v179_v62  ;;  %v203_v1 = vadd.f32 %v455_v18, %v183_v63 }
  0xab   :  { %v222_v20 = vmax.f32 %v206_v12, 0.0  ;;  %v226_v21 = vmax.f32 %v210_v13, 0.0 }
  0xac   :  { %v215_v6 = vmax.f32 %v199_v0, 0.0  ;;  %v219_v7 = vmax.f32 %v203_v1, 0.0 }
  0xae   :  { %v330_v8 = vpack.c.bf16 %v215_v6, %v214_v4  ;;  %v340_v9 = vpack.c.bf16 %v219_v7, %v218_v5  ;;  %v159_v10 = vpop.f32.mrf.mxu2  ;;  %v169_v11 = vpop.f32.mrf.mxu3 }
  0xaf   :  { %v187_v14 = vmul.f32 %v449_v16, %v159_v10  ;;  %v191_v15 = vmul.f32 %v449_v16, %v169_v11 }
  0xb0   :  { %362 = vst [vmem:[%s516_s4 + $0x8] sm:$0xff] %v330_v8  }
  0xb1   :  { %364 = vst [vmem:[%s516_s4 + $0x18] sm:$0xff] %v340_v9   ;;  %v207_v17 = vadd.f32 %v455_v18, %v187_v14  ;;  %v211_v19 = vadd.f32 %v455_v18, %v191_v15 }
  0xb3   :  { %v223_v22 = vmax.f32 %v207_v17, 0.0  ;;  %v227_v23 = vmax.f32 %v211_v19, 0.0 }
  0xb5   :  { %v350_v24 = vpack.c.bf16 %v223_v22, %v222_v20  ;;  %v360_v25 = vpack.c.bf16 %v227_v23, %v226_v21 }
  0xb7   :  { %366 = vst [vmem:[%s516_s4 + $0x28] sm:$0xff] %v350_v24  }
  0xb8   :  { %368 = vst [vmem:[%s516_s4 + $0x38] sm:$0xff] %v360_v25  }

// kernel: residual_block_pallas.4
= control target key start
LH: loop header
LB: loop body
LE: loop exit
PB: predicated region body
PF: predicated region fallthrough
CT: control target
= control target key end

     0   :  { %vm100_vm0 = vcmask 1041408   ;;  %vm75_vm1 = vcmask 31744   ;;  %s398_s1 = inlined_call_operand.vmem [shape: bf16[4,128], index: 1, kind: input, shape index: {}]   ;;  %s399_s0 = inlined_call_operand.vmem [shape: bf16[128,4], index: 0, kind: input, shape index: {}]   ;;  %s400_s2 = inlined_call_operand.vmem [shape: f32[1,128], index: 2, kind: input, shape index: {}]   ;;  %s401_s3 = inlined_call_operand.vmem [shape: f32[1,128], index: 3, kind: input, shape index: {}]   ;;  %s402_s4 = inlined_call_operand.vmem [shape: f32[128,128], index: 4, kind: output, shape index: {}]  }
   0x1   :  { %v34_v0 = vld [vmem:[%s398_s1] sm:$0x3]  ;;  %v255_v3 = vld [vmem:[%s399_s0 + $0x10] sm:$0xff]  ;;  %v254_v6 = vld [vmem:[%s399_s0 + $0x8] sm:$0xff] }
   0x2   :  { %v102_v1 = vsel %vm100_vm0, %v34_v0, 0  ;;  %v253_v2 = vld [vmem:[%s399_s0] sm:$0xff]  ;;  %v259_v5 = vld [vmem:[%s399_s0 + $0x30] sm:$0xff]  ;;  %v256_v7 = vld [vmem:[%s399_s0 + $0x18] sm:$0xff] }
   0x3   :  { %111 = vmatpush.bf16.msra.mxu0 %v102_v1  ;;  %261 = vmatpush.bf16.msra.mxu1 %v102_v1  ;;  %v257_v4 = vld [vmem:[%s399_s0 + $0x20] sm:$0xff]  ;;  %v258_v8 = vld [vmem:[%s399_s0 + $0x28] sm:$0xff]  ;;  %v260_v9 = vld [vmem:[%s399_s0 + $0x38] sm:$0xff] }
   0x4   :  { %262 = vmatpush.bf16.msra.mxu2 %v102_v1  ;;  %263 = vmatpush.bf16.msra.mxu3 %v102_v1  ;;  %v264_v10 = vld [vmem:[%s400_s2] ss:$0 sm:$0xff] }
   0x5   :  { %v332_v11 = vld [vmem:[%s401_s3] ss:$0 sm:$0xff] }
   0x6   :  { %245 = vmatmul.msk.bf16.vlgmr.msra.gmra.mxu0 %vm75_vm1, %v253_v2  ;;  %247 = vmatmul.msk.bf16.vlgmr.msra.gmra.mxu1 %vm75_vm1, %v255_v3 }
   0x7   :  { %249 = vmatmul.msk.bf16.vlgmr.msra.gmra.mxu2 %vm75_vm1, %v257_v4  ;;  %251 = vmatmul.msk.bf16.vlgmr.msra.gmra.mxu3 %vm75_vm1, %v259_v5 }
  0x16   :  { %246 = vmatmul.msk.bf16.gmra.mxu0 %vm75_vm1, %v254_v6  ;;  %248 = vmatmul.msk.bf16.gmra.mxu1 %vm75_vm1, %v256_v7 }
  0x17   :  { %250 = vmatmul.msk.bf16.gmra.mxu2 %vm75_vm1, %v258_v8  ;;  %252 = vmatmul.msk.bf16.gmra.mxu3 %vm75_vm1, %v260_v9 }
  0x83   :  { %v113_v12 = vpop.f32.mrf.mxu0  ;;  %v123_v13 = vpop.f32.mrf.mxu1 }
  0x84   :  { %v157_v14 = vmul.f32 %v264_v10, %v113_v12  ;;  %v161_v15 = vmul.f32 %v264_v10, %v123_v13 }
  0x86   :  { %v177_v16 = vadd.f32 %v332_v11, %v157_v14  ;;  %v181_v17 = vadd.f32 %v332_v11, %v161_v15 }
  0x88   :  { %193 = vst [vmem:[%s402_s4] sm:$0xff] %v177_v16 }
  0x89   :  { %197 = vst [vmem:[%s402_s4 + $0x20] sm:$0xff] %v181_v17 }
  0x8a   :  { %v133_v18 = vpop.f32.mrf.mxu2  ;;  %v143_v19 = vpop.f32.mrf.mxu3 }
  0x8b   :  { %v165_v20 = vmul.f32 %v264_v10, %v133_v18  ;;  %v169_v21 = vmul.f32 %v264_v10, %v143_v19  ;;  %v115_v22 = vpop.f32.mrf.mxu0  ;;  %v125_v23 = vpop.f32.mrf.mxu1 }
  0x8c   :  { %v158_v24 = vmul.f32 %v264_v10, %v115_v22  ;;  %v162_v25 = vmul.f32 %v264_v10, %v125_v23 }
  0x8d   :  { %v185_v26 = vadd.f32 %v332_v11, %v165_v20  ;;  %v189_v27 = vadd.f32 %v332_v11, %v169_v21 }
  0x8e   :  { %v178_v28 = vadd.f32 %v332_v11, %v158_v24  ;;  %v182_v29 = vadd.f32 %v332_v11, %v162_v25 }
  0x8f   :  { %201 = vst [vmem:[%s402_s4 + $0x40] sm:$0xff] %v185_v26 }
  0x90   :  { %205 = vst [vmem:[%s402_s4 + $0x60] sm:$0xff] %v189_v27 }
  0x91   :  { %194 = vst [vmem:[%s402_s4 + $0x8] sm:$0xff] %v178_v28 }
  0x92   :  { %198 = vst [vmem:[%s402_s4 + $0x28] sm:$0xff] %v182_v29  ;;  %v135_v30 = vpop.f32.mrf.mxu2  ;;  %v145_v31 = vpop.f32.mrf.mxu3 }
  0x93   :  { %v166_v32 = vmul.f32 %v264_v10, %v135_v30  ;;  %v170_v33 = vmul.f32 %v264_v10, %v145_v31  ;;  %v118_v34 = vpop.f32.mrf.mxu0  ;;  %v128_v35 = vpop.f32.mrf.mxu1 }
  0x94   :  { %v159_v36 = vmul.f32 %v264_v10, %v118_v34  ;;  %v163_v37 = vmul.f32 %v264_v10, %v128_v35 }
  0x95   :  { %v186_v38 = vadd.f32 %v332_v11, %v166_v32  ;;  %v190_v39 = vadd.f32 %v332_v11, %v170_v33 }
  0x96   :  { %v179_v40 = vadd.f32 %v332_v11, %v159_v36  ;;  %v183_v41 = vadd.f32 %v332_v11, %v163_v37 }
  0x97   :  { %202 = vst [vmem:[%s402_s4 + $0x48] sm:$0xff] %v186_v38 }
  0x98   :  { %206 = vst [vmem:[%s402_s4 + $0x68] sm:$0xff] %v190_v39 }
  0x99   :  { %195 = vst [vmem:[%s402_s4 + $0x10] sm:$0xff] %v179_v40 }
  0x9a   :  { %199 = vst [vmem:[%s402_s4 + $0x30] sm:$0xff] %v183_v41  ;;  %v138_v42 = vpop.f32.mrf.mxu2  ;;  %v148_v43 = vpop.f32.mrf.mxu3 }
  0x9b   :  { %v167_v44 = vmul.f32 %v264_v10, %v138_v42  ;;  %v171_v45 = vmul.f32 %v264_v10, %v148_v43  ;;  %v120_v46 = vpop.f32.mrf.mxu0  ;;  %v130_v47 = vpop.f32.mrf.mxu1 }
  0x9c   :  { %v160_v48 = vmul.f32 %v264_v10, %v120_v46  ;;  %v164_v49 = vmul.f32 %v264_v10, %v130_v47 }
  0x9d   :  { %v187_v50 = vadd.f32 %v332_v11, %v167_v44  ;;  %v191_v51 = vadd.f32 %v332_v11, %v171_v45 }
  0x9e   :  { %v180_v52 = vadd.f32 %v332_v11, %v160_v48  ;;  %v184_v53 = vadd.f32 %v332_v11, %v164_v49 }
  0x9f   :  { %203 = vst [vmem:[%s402_s4 + $0x50] sm:$0xff] %v187_v50 }
  0xa0   :  { %207 = vst [vmem:[%s402_s4 + $0x70] sm:$0xff] %v191_v51 }
  0xa1   :  { %196 = vst [vmem:[%s402_s4 + $0x18] sm:$0xff] %v180_v52 }
  0xa2   :  { %200 = vst [vmem:[%s402_s4 + $0x38] sm:$0xff] %v184_v53  ;;  %v140_v54 = vpop.f32.mrf.mxu2  ;;  %v150_v55 = vpop.f32.mrf.mxu3 }
  0xa3   :  { %v168_v56 = vmul.f32 %v264_v10, %v140_v54  ;;  %v172_v57 = vmul.f32 %v264_v10, %v150_v55 }
  0xa5   :  { %v188_v58 = vadd.f32 %v332_v11, %v168_v56  ;;  %v192_v59 = vadd.f32 %v332_v11, %v172_v57 }
  0xa7   :  { %204 = vst [vmem:[%s402_s4 + $0x58] sm:$0xff] %v188_v58 }
  0xa8   :  { %208 = vst [vmem:[%s402_s4 + $0x78] sm:$0xff] %v192_v59 }

// kernel: residual_block_pallas.5
= control target key start
LH: loop header
LB: loop body
LE: loop exit
PB: predicated region body
PF: predicated region fallthrough
CT: control target
= control target key end

     0   :  { %vm138_vm0 = vcmask 1043456   ;;  %vm113_vm1 = vcmask 588800   ;;  %s599_s1 = inlined_call_operand.vmem [shape: bf16[72,128], index: 1, kind: input, shape index: {}]   ;;  %s600_s2 = inlined_call_operand.vmem [shape: f32[1,128], index: 2, kind: input, shape index: {}]   ;;  %s601_s3 = inlined_call_operand.vmem [shape: f32[1,128], index: 3, kind: input, shape index: {}]   ;;  %s602_s0 = inlined_call_operand.vmem [shape: bf16[128,72], index: 0, kind: input, shape index: {}]   ;;  %s603_s4 = inlined_call_operand.vmem [shape: f32[128,128], index: 4, kind: input, shape index: {}]   ;;  %s604_s5 = inlined_call_operand.vmem [shape: f32[128,128], index: 5, kind: output, shape index: {}]  }
   0x1   :  { %v45_v0 = vld [vmem:[%s599_s1 + $0x20] sm:$0xf]  ;;  %v366_v4 = vld [vmem:[%s599_s1 + $0x18] sm:$0xff]  ;;  %v365_v5 = vld [vmem:[%s599_s1 + $0x10] sm:$0xff] }
   0x2   :  { %v103_v1 = vunpack.c.l.b16 %v45_v0  ;;  %v364_v6 = vld [vmem:[%s599_s1 + $0x8] sm:$0xff]  ;;  %v363_v7 = vld [vmem:[%s599_s1] sm:$0xff]  ;;  %v357_v9 = vld [vmem:[%s602_s0 + $0x10] sm:$0xff] }
   0x3   :  { %v355_v8 = vld [vmem:[%s602_s0] sm:$0xff]  ;;  %v361_v11 = vld [vmem:[%s602_s0 + $0x30] sm:$0xff]  ;;  %v356_v12 = vld [vmem:[%s602_s0 + $0x8] sm:$0xff] }
   0x4   :  { %v108_v2 = vpack.c.b16 %v103_v1, %v103_v1  ;;  %v359_v10 = vld [vmem:[%s602_s0 + $0x20] sm:$0xff]  ;;  %v358_v13 = vld [vmem:[%s602_s0 + $0x18] sm:$0xff]  ;;  %v360_v14 = vld [vmem:[%s602_s0 + $0x28] sm:$0xff] }
   0x5   :  { %v362_v15 = vld [vmem:[%s602_s0 + $0x38] sm:$0xff]  ;;  %v464_v16 = vld [vmem:[%s600_s2] ss:$0 sm:$0xff]  ;;  %v232_v42 = vld [vmem:[%s603_s4 + $0x8] sm:$0xff] }
   0x6   :  { %v140_v3 = vsel %vm138_vm0, %v108_v2, 0  ;;  %v469_v17 = vld [vmem:[%s601_s3] ss:$0 sm:$0xff]  ;;  %v236_v43 = vld [vmem:[%s603_s4 + $0x28] sm:$0xff]  ;;  %v233_v2 = vld [vmem:[%s603_s4 + $0x10] sm:$0xff] }
   0x7   :  { %145 = vmatpush.bf16.msra.mxu0 %v140_v3  ;;  %367 = vmatpush.bf16.msra.mxu1 %v140_v3  ;;  %v231_v22 = vld [vmem:[%s603_s4] sm:$0xff]  ;;  %v240_v60 = vld [vmem:[%s603_s4 + $0x48] sm:$0xff] }
   0x8   :  { %368 = vmatpush.bf16.msra.mxu2 %v140_v3  ;;  %369 = vmatpush.bf16.msra.mxu3 %v140_v3  ;;  %v235_v23 = vld [vmem:[%s603_s4 + $0x20] sm:$0xff]  ;;  %v244_v61 = vld [vmem:[%s603_s4 + $0x68] sm:$0xff]  ;;  %v237_v3 = vld [vmem:[%s603_s4 + $0x30] sm:$0xff] }
   0x9   :  { %v239_v36 = vld [vmem:[%s603_s4 + $0x40] sm:$0xff] }
   0xa   :  { %v243_v37 = vld [vmem:[%s603_s4 + $0x60] sm:$0xff] }
   0xb   :  { %146 = vmatpush.bf16.msra.mxu0 %v366_v4  ;;  %370 = vmatpush.bf16.msra.mxu1 %v366_v4 }
   0xc   :  { %371 = vmatpush.bf16.msra.mxu2 %v366_v4  ;;  %372 = vmatpush.bf16.msra.mxu3 %v366_v4 }
   0xf   :  { %147 = vmatpush.bf16.msra.mxu0 %v365_v5  ;;  %373 = vmatpush.bf16.msra.mxu1 %v365_v5 }
  0x10   :  { %374 = vmatpush.bf16.msra.mxu2 %v365_v5  ;;  %375 = vmatpush.bf16.msra.mxu3 %v365_v5 }
  0x13   :  { %148 = vmatpush.bf16.msra.mxu0 %v364_v6  ;;  %376 = vmatpush.bf16.msra.mxu1 %v364_v6 }
  0x14   :  { %377 = vmatpush.bf16.msra.mxu2 %v364_v6  ;;  %378 = vmatpush.bf16.msra.mxu3 %v364_v6 }
  0x17   :  { %149 = vmatpush.bf16.msra.mxu0 %v363_v7  ;;  %379 = vmatpush.bf16.msra.mxu1 %v363_v7 }
  0x18   :  { %380 = vmatpush.bf16.msra.mxu2 %v363_v7  ;;  %381 = vmatpush.bf16.msra.mxu3 %v363_v7 }
  0x1a   :  { %347 = vmatmul.msk.bf16.vlgmr.msra.gmra.mxu0 %vm113_vm1, %v355_v8  ;;  %349 = vmatmul.msk.bf16.vlgmr.msra.gmra.mxu1 %vm113_vm1, %v357_v9 }
  0x1b   :  { %351 = vmatmul.msk.bf16.vlgmr.msra.gmra.mxu2 %vm113_vm1, %v359_v10  ;;  %353 = vmatmul.msk.bf16.vlgmr.msra.gmra.mxu3 %vm113_vm1, %v361_v11 }
  0x2a   :  { %348 = vmatmul.msk.bf16.gmra.mxu0 %vm113_vm1, %v356_v12  ;;  %350 = vmatmul.msk.bf16.gmra.mxu1 %vm113_vm1, %v358_v13 }
  0x2b   :  { %352 = vmatmul.msk.bf16.gmra.mxu2 %vm113_vm1, %v360_v14  ;;  %354 = vmatmul.msk.bf16.gmra.mxu3 %vm113_vm1, %v362_v15 }
  0x97   :  { %v151_v18 = vpop.f32.mrf.mxu0  ;;  %v161_v19 = vpop.f32.mrf.mxu1 }
  0x98   :  { %v195_v20 = vmul.f32 %v464_v16, %v151_v18  ;;  %v199_v21 = vmul.f32 %v464_v16, %v161_v19 }
  0x9a   :  { %v215_v24 = vadd.f32 %v469_v17, %v195_v20  ;;  %v219_v25 = vadd.f32 %v469_v17, %v199_v21 }
  0x9c   :  { %v247_v26 = vadd.f32 %v231_v22, %v215_v24  ;;  %v251_v27 = vadd.f32 %v235_v23, %v219_v25  ;;  %v241_v22 = vld [vmem:[%s603_s4 + $0x50] sm:$0xff] }
  0x9d   :  { %v245_v23 = vld [vmem:[%s603_s4 + $0x70] sm:$0xff] }
  0x9e   :  { %v263_v28 = vmax.f32 %v247_v26, 0.0  ;;  %v267_v29 = vmax.f32 %v251_v27, 0.0  ;;  %v171_v30 = vpop.f32.mrf.mxu2  ;;  %v181_v31 = vpop.f32.mrf.mxu3 }
  0x9f   :  { %v203_v32 = vmul.f32 %v464_v16, %v171_v30  ;;  %v207_v33 = vmul.f32 %v464_v16, %v181_v31  ;;  %v153_v34 = vpop.f32.mrf.mxu0  ;;  %v163_v35 = vpop.f32.mrf.mxu1 }
  0xa0   :  { %279 = vst [vmem:[%s604_s5] sm:$0xff] %v263_v28  ;;  %v196_v38 = vmul.f32 %v464_v16, %v153_v34  ;;  %v200_v39 = vmul.f32 %v464_v16, %v163_v35  ;;  %v234_v28 = vld [vmem:[%s603_s4 + $0x18] sm:$0xff] }
  0xa1   :  { %283 = vst [vmem:[%s604_s5 + $0x20] sm:$0xff] %v267_v29  ;;  %v223_v40 = vadd.f32 %v469_v17, %v203_v32  ;;  %v227_v41 = vadd.f32 %v469_v17, %v207_v33  ;;  %v238_v29 = vld [vmem:[%s603_s4 + $0x38] sm:$0xff] }
  0xa2   :  { %v216_v44 = vadd.f32 %v469_v17, %v196_v38  ;;  %v220_v45 = vadd.f32 %v469_v17, %v200_v39 }
  0xa3   :  { %v255_v46 = vadd.f32 %v239_v36, %v223_v40  ;;  %v259_v47 = vadd.f32 %v243_v37, %v227_v41 }
  0xa4   :  { %v248_v48 = vadd.f32 %v232_v42, %v216_v44  ;;  %v252_v49 = vadd.f32 %v236_v43, %v220_v45  ;;  %v242_v44 = vld [vmem:[%s603_s4 + $0x58] sm:$0xff] }
  0xa5   :  { %v271_v50 = vmax.f32 %v255_v46, 0.0  ;;  %v275_v51 = vmax.f32 %v259_v47, 0.0  ;;  %v246_v45 = vld [vmem:[%s603_s4 + $0x78] sm:$0xff] }
  0xa6   :  { %v264_v52 = vmax.f32 %v248_v48, 0.0  ;;  %v268_v53 = vmax.f32 %v252_v49, 0.0  ;;  %v173_v54 = vpop.f32.mrf.mxu2  ;;  %v183_v55 = vpop.f32.mrf.mxu3 }
  0xa7   :  { %287 = vst [vmem:[%s604_s5 + $0x40] sm:$0xff] %v271_v50  ;;  %v204_v56 = vmul.f32 %v464_v16, %v173_v54  ;;  %v208_v57 = vmul.f32 %v464_v16, %v183_v55  ;;  %v156_v58 = vpop.f32.mrf.mxu0  ;;  %v166_v59 = vpop.f32.mrf.mxu1 }
  0xa8   :  { %291 = vst [vmem:[%s604_s5 + $0x60] sm:$0xff] %v275_v51  ;;  %v197_v62 = vmul.f32 %v464_v16, %v156_v58  ;;  %v201_v63 = vmul.f32 %v464_v16, %v166_v59 }
  0xa9   :  { %280 = vst [vmem:[%s604_s5 + $0x8] sm:$0xff] %v264_v52  ;;  %v224_v0 = vadd.f32 %v469_v17, %v204_v56  ;;  %v228_v1 = vadd.f32 %v469_v17, %v208_v57 }
  0xaa   :  { %284 = vst [vmem:[%s604_s5 + $0x28] sm:$0xff] %v268_v53  ;;  %v217_v4 = vadd.f32 %v469_v17, %v197_v62  ;;  %v221_v5 = vadd.f32 %v469_v17, %v201_v63 }
  0xab   :  { %v256_v6 = vadd.f32 %v240_v60, %v224_v0  ;;  %v260_v7 = vadd.f32 %v244_v61, %v228_v1 }
  0xac   :  { %v249_v8 = vadd.f32 %v233_v2, %v217_v4  ;;  %v253_v9 = vadd.f32 %v237_v3, %v221_v5 }
  0xad   :  { %v272_v10 = vmax.f32 %v256_v6, 0.0  ;;  %v276_v11 = vmax.f32 %v260_v7, 0.0 }
  0xae   :  { %v265_v12 = vmax.f32 %v249_v8, 0.0  ;;  %v269_v13 = vmax.f32 %v253_v9, 0.0  ;;  %v176_v14 = vpop.f32.mrf.mxu2  ;;  %v186_v15 = vpop.f32.mrf.mxu3 }
  0xaf   :  { %288 = vst [vmem:[%s604_s5 + $0x48] sm:$0xff] %v272_v10  ;;  %v205_v18 = vmul.f32 %v464_v16, %v176_v14  ;;  %v209_v19 = vmul.f32 %v464_v16, %v186_v15  ;;  %v158_v20 = vpop.f32.mrf.mxu0  ;;  %v168_v21 = vpop.f32.mrf.mxu1 }
  0xb0   :  { %292 = vst [vmem:[%s604_s5 + $0x68] sm:$0xff] %v276_v11  ;;  %v198_v24 = vmul.f32 %v464_v16, %v158_v20  ;;  %v202_v25 = vmul.f32 %v464_v16, %v168_v21 }
  0xb1   :  { %281 = vst [vmem:[%s604_s5 + $0x10] sm:$0xff] %v265_v12  ;;  %v225_v26 = vadd.f32 %v469_v17, %v205_v18  ;;  %v229_v27 = vadd.f32 %v469_v17, %v209_v19 }
  0xb2   :  { %285 = vst [vmem:[%s604_s5 + $0x30] sm:$0xff] %v269_v13  ;;  %v218_v30 = vadd.f32 %v469_v17, %v198_v24  ;;  %v222_v31 = vadd.f32 %v469_v17, %v202_v25 }
  0xb3   :  { %v257_v32 = vadd.f32 %v241_v22, %v225_v26  ;;  %v261_v33 = vadd.f32 %v245_v23, %v229_v27 }
  0xb4   :  { %v250_v34 = vadd.f32 %v234_v28, %v218_v30  ;;  %v254_v35 = vadd.f32 %v238_v29, %v222_v31 }
  0xb5   :  { %v273_v36 = vmax.f32 %v257_v32, 0.0  ;;  %v277_v37 = vmax.f32 %v261_v33, 0.0 }
  0xb6   :  { %v266_v38 = vmax.f32 %v250_v34, 0.0  ;;  %v270_v39 = vmax.f32 %v254_v35, 0.0  ;;  %v178_v40 = vpop.f32.mrf.mxu2  ;;  %v188_v41 = vpop.f32.mrf.mxu3 }
  0xb7   :  { %289 = vst [vmem:[%s604_s5 + $0x50] sm:$0xff] %v273_v36  ;;  %v206_v42 = vmul.f32 %v464_v16, %v178_v40  ;;  %v210_v43 = vmul.f32 %v464_v16, %v188_v41 }
  0xb8   :  { %293 = vst [vmem:[%s604_s5 + $0x70] sm:$0xff] %v277_v37 }
  0xb9   :  { %282 = vst [vmem:[%s604_s5 + $0x18] sm:$0xff] %v266_v38  ;;  %v226_v46 = vadd.f32 %v469_v17, %v206_v42  ;;  %v230_v16 = vadd.f32 %v469_v17, %v210_v43 }
  0xba   :  { %286 = vst [vmem:[%s604_s5 + $0x38] sm:$0xff] %v270_v39 }
  0xbb   :  { %v258_v47 = vadd.f32 %v242_v44, %v226_v46  ;;  %v262_v48 = vadd.f32 %v246_v45, %v230_v16 }
  0xbd   :  { %v274_v49 = vmax.f32 %v258_v47, 0.0  ;;  %v278_v50 = vmax.f32 %v262_v48, 0.0 }
  0xbf   :  { %290 = vst [vmem:[%s604_s5 + $0x58] sm:$0xff] %v274_v49 }
  0xc0   :  { %294 = vst [vmem:[%s604_s5 + $0x78] sm:$0xff] %v278_v50 }

</bundles_post_ra>
